<compile_context>
chip_gen: v5e
topology: v5e:2x2
jax: 0.10.0
libtpu: 0.0.40
codegen_flags: <defaults>
</compile_context>

<pallas_src>
import functools

import jax
import jax.numpy as jnp
from jax.experimental import pallas as pl
from jax.experimental.pallas import tpu as pltpu


def _round_up(n, m):
    return ((n + m - 1) // m) * m


def _resize_weights(out_len, full_len, sizes, offs):
    """(N, out_len, full_len) align_corners=False bilinear crop+resize weight matrices.

    Row t of matrix n holds the (<= 2-tap) bilinear weights mapping the `sizes[n]`-wide crop
    starting at `offs[n]` of a `full_len`-wide axis onto output pixel t.
    """
    sizes = sizes.astype(jnp.int32)
    offs = offs.astype(jnp.int32)
    t = jnp.arange(out_len, dtype=jnp.float32)[None, :]                     # (1, T)
    size_f = sizes.astype(jnp.float32)[:, None]                             # (N, 1)
    src = jnp.clip((t + 0.5) * (size_f / out_len) - 0.5, 0.0, size_f - 1.0)  # (N, T)
    lo_f = jnp.floor(src)
    w_hi = (src - lo_f)[:, :, None]                                         # (N, T, 1)
    lo = lo_f.astype(jnp.int32) + offs[:, None]                             # (N, T)
    hi = jnp.minimum(lo_f.astype(jnp.int32) + 1, sizes[:, None] - 1) + offs[:, None]
    grid = jnp.arange(full_len, dtype=jnp.int32)[None, None, :]             # (1, 1, F)
    return (jnp.where(grid == lo[:, :, None], 1.0 - w_hi, 0.0)
            + jnp.where(grid == hi[:, :, None], w_hi, 0.0))                 # (N, T, F) f32


def _build_weights(sizes, offy, offx, flips, cut_size, H, W, Tp):
    """Per-cutout bf16 crop/resize weights: Wy (cutn, T, H) and Wx (cutn, W, Tp)."""
    T = cut_size
    wy = _resize_weights(T, H, sizes, offy).astype(jnp.bfloat16)            # (N, T, H)
    wx = jnp.swapaxes(_resize_weights(T, W, sizes, offx), 1, 2)             # (N, W, T)
    wx = jnp.where(flips[:, None, None] != 0, wx[:, :, ::-1], wx)           # fold h-flip
    wx = jnp.pad(wx, ((0, 0), (0, 0), (0, Tp - T))).astype(jnp.bfloat16)    # (N, W, Tp)
    return wy, wx


def _make_cutouts_kernel(G, BC, use_noise, *refs):
    if use_noise:
        wy_ref, wx_ref, x_ref, noise_ref, fac_ref, o_ref = refs
    else:
        wy_ref, wx_ref, x_ref, o_ref = refs

    x = x_ref[...]                                   # (BC, H, W) bf16, grid-invariant slab
    n0 = pl.program_id(0) * G

    for g in range(G):                               # static unroll over grouped cutouts
        # Batched (over the B*C planes) MXU matmuls, bf16 operands / f32 accumulation.
        wy = jnp.broadcast_to(wy_ref[g], (BC,) + wy_ref.shape[1:])          # (BC, T, H)
        wx = jnp.broadcast_to(wx_ref[g], (BC,) + wx_ref.shape[1:])          # (BC, W, Tp)
        rows = jnp.einsum('bth,bhw->btw', wy, x,
                          preferred_element_type=jnp.float32)               # (BC, T, W)
        cut = jnp.einsum('btw,bwu->btu', rows.astype(jnp.bfloat16), wx,
                         preferred_element_type=jnp.float32)                # (BC, T, Tp)
        if use_noise:
            # batch + fac * randn  (fac per cutout from SMEM, bf16 noise added in f32)
            cut = cut + fac_ref[n0 + g] * noise_ref[g].astype(jnp.float32)
        o_ref[g] = cut.astype(o_ref.dtype)           # lane-dense, 128-aligned store


def _vmem_limit_bytes():
    # Generation-aware budget: ~3/4 of physical VMEM (48 MiB on v7x, 96 MiB on v5e/v6e).
    try:
        cap = pltpu.get_tpu_info().vmem_capacity_bytes
        return int(min(96 * 1024 * 1024, cap * 3 // 4))
    except Exception:
        return 48 * 1024 * 1024


def _pick_group(cutn, per_cut_bytes, budget_bytes, cap=8):
    """Cutouts per grid step: amortize per-step overhead (single TC on v5e/v6e) while keeping
    >= 2 grid steps (v7x megacore) and staying inside the VMEM budget."""
    g = 1
    for cand in range(2, min(cutn, cap) + 1):
        if cutn % cand or cutn // cand < 2:
            continue
        if cand * per_cut_bytes > budget_bytes:
            continue
        g = cand
    return g


def make_cutouts(x, sizes, offy, offx, flips, noise, facs, *, cut_size,
                 noise_fac=0.1, group=None):
    """Pallas implementation of MakeCutouts.forward (minus the un-translatable kornia augs)."""
    B, C, H, W = x.shape
    cutn = int(sizes.shape[0])
    T = cut_size
    BC = B * C
    Tp = _round_up(T, 128)                       # 128-aligned output lane dimension
    use_noise = bool(noise_fac)
    out_itemsize = jnp.dtype(x.dtype).itemsize

    vmem_limit = _vmem_limit_bytes()

    # Wrapper-side weight construction: no VALU-heavy index math inside the kernel.
    wy, wx = _build_weights(sizes, offy, offx, flips, T, H, W, Tp)

    # Image slab (B*C, H, W) bf16, resident in VMEM across the whole grid.
    x_slab = x.reshape(BC, H, W).astype(jnp.bfloat16)
    x_bytes = BC * H * W * 2

    if group is None:
        per_cut = (2 * ((BC * T * Tp * 2 if use_noise else 0)     # noise (bf16, dbl-buffered)
                        + BC * T * Tp * out_itemsize              # output  (dbl-buffered)
                        + (T * H + W * Tp) * 2)                   # Wy + Wx (bf16, dbl-buffered)
                   + BC * T * (W + Tp) * 4)                       # f32 matmul intermediates
        budget = vmem_limit - x_bytes - (4 << 20)                 # headroom for scratch
        group = _pick_group(cutn, per_cut, budget)
    assert cutn % group == 0, (cutn, group)
    G = group

    in_specs = [
        pl.BlockSpec((G, T, H), lambda n: (n, 0, 0)),
        pl.BlockSpec((G, W, Tp), lambda n: (n, 0, 0)),
        # Whole image slab, constant index_map -> fetched once; single-buffered to halve
        # its resident VMEM footprint.
        pl.BlockSpec((BC, H, W), lambda n: (0, 0, 0), pipeline_mode=pl.Buffered(1)),
    ]
    args = [wy, wx, x_slab]
    if use_noise:
        in_specs.append(pl.BlockSpec((G, BC, T, Tp), lambda n: (n, 0, 0, 0)))
        in_specs.append(pl.BlockSpec(memory_space=pltpu.MemorySpace.SMEM))
        args += [noise.astype(jnp.bfloat16), facs.astype(jnp.float32)]

    kernel = functools.partial(_make_cutouts_kernel, G, BC, use_noise)
    out_flat = pl.pallas_call(
        kernel,
        out_shape=jax.ShapeDtypeStruct((cutn, BC, T, Tp), x.dtype),
        grid_spec=pltpu.PrefetchScalarGridSpec(
            num_scalar_prefetch=0,
            grid=(cutn // G,),
            in_specs=in_specs,
            out_specs=pl.BlockSpec((G, BC, T, Tp), lambda n: (n, 0, 0, 0)),
        ),
        compiler_params=pltpu.CompilerParams(
            dimension_semantics=("parallel",),       # cutout groups are independent
            vmem_limit_bytes=vmem_limit,
        ),
    )(*args)

    # Drop the lane padding and untangle to the torch.cat(cutouts, dim=0) layout.
    return out_flat[..., :T].reshape(cutn * B, C, T, T)


def random_cutout_params(key, x_shape, cut_size, cutn, cut_pow=1.0, noise_fac=0.1):
    """Draw the same randoms the torch module draws (sizes / offsets / flip / noise)."""
    B, C, H, W = x_shape
    max_size = min(H, W)
    min_size = min(H, W, cut_size)
    Tp = _round_up(cut_size, 128)
    k = jax.random.split(key, 6)
    r = jax.random.uniform(k[0], (cutn,), dtype=jnp.float32)
    sizes = (r ** cut_pow * (max_size - min_size) + min_size).astype(jnp.int32)
    offx = jnp.floor(jax.random.uniform(k[1], (cutn,), dtype=jnp.float32)
                     * (W - sizes + 1).astype(jnp.float32)).astype(jnp.int32)
    offy = jnp.floor(jax.random.uniform(k[2], (cutn,), dtype=jnp.float32)
                     * (H - sizes + 1).astype(jnp.float32)).astype(jnp.int32)
    flips = (jax.random.uniform(k[3], (cutn,)) < 0.5).astype(jnp.int32)
    # Per-cutout noise magnitude, shared across the batch/channel slab (matches the torch
    # reference for its usual B == 1 usage).
    facs = jax.random.uniform(k[4], (cutn,), minval=0.0, maxval=noise_fac,
                              dtype=jnp.float32)
    # Gaussian noise pre-drawn in bf16 at the kernel's padded lane-dense layout; the on-chip
    # stateful PRNG is avoided so the kernel also lowers under interpret mode, and bf16
    # halves the per-step noise DMA.
    noise = jax.random.normal(k[5], (cutn, B * C, cut_size, Tp), dtype=jnp.bfloat16)
    return sizes, offy, offx, flips, noise, facs


if __name__ == "__main__":
    key = jax.random.PRNGKey(0)
    kx, kp = jax.random.split(key)

    # small shapes consistent with the module's forward
    B, C, H, W = 2, 3, 16, 16
    cut_size, cutn, cut_pow, noise_fac = 8, 4, 1.0, 0.1
    T, Tp, BC = cut_size, _round_up(cut_size, 128), B * C

    x = jax.random.uniform(kx, (B, C, H, W), dtype=jnp.float32)
    sizes, offy, offx, flips, noise, facs = random_cutout_params(
        kp, x.shape, cut_size, cutn, cut_pow, noise_fac)

    out = make_cutouts(x, sizes, offy, offx, flips, noise, facs,
                       cut_size=cut_size, noise_fac=noise_fac)
    out = jax.block_until_ready(out)

    assert out.shape == (cutn * B, C, T, T), out.shape
    assert out.dtype == x.dtype
    assert bool(jnp.all(jnp.isfinite(out)))

    # Pure-JAX reference (same bf16 weights / image / noise, f32 math throughout).
    wy_ref, wx_ref = _build_weights(sizes, offy, offx, flips, T, H, W, Tp)
    x_bf = x.reshape(BC, H, W).astype(jnp.bfloat16).astype(jnp.float32)
    ref = jnp.einsum('nth,bhw->nbtw', wy_ref.astype(jnp.float32), x_bf)
    ref = jnp.einsum('nbtw,nwu->nbtu', ref, wx_ref.astype(jnp.float32))
    ref = ref + facs[:, None, None, None] * noise.astype(jnp.float32)
    ref = ref[..., :T].reshape(cutn * B, C, T, T)
    max_err = float(jnp.max(jnp.abs(out - ref)))
    assert max_err < 0.08, max_err

    print("KERNEL_OK")
</pallas_src>

<mosaic_0001>
module attributes {stable_mosaic.version = 11 : i64} {
  func.func @_make_cutouts_kernel(%arg0: i32, %arg1: memref<2x8x16xbf16, #tpu.memory_space<vmem>>, %arg2: memref<2x16x128xbf16, #tpu.memory_space<vmem>>, %arg3: memref<6x16x16xbf16, #tpu.memory_space<vmem>>, %arg4: memref<2x6x8x128xbf16, #tpu.memory_space<vmem>>, %arg5: memref<4xf32, #tpu.memory_space<smem>>, %arg6: memref<2x6x8x128xf32, #tpu.memory_space<vmem>>) attributes {dimension_semantics = [#tpu.dimension_semantics<parallel>], iteration_bounds = array<i64: 2>, scalar_prefetch = 0 : i64, scratch_operands = 0 : i64, tpu.core_type = #tpu.core_type<tc>, window_params = [{transform_indices = @transform_0, window_bounds = array<i64: 2, 8, 16>}, {transform_indices = @transform_1, window_bounds = array<i64: 2, 16, 128>}, {pipeline_mode = #tpu.pipeline_mode<synchronous>, transform_indices = @transform_2, window_bounds = array<i64: 6, 16, 16>}, {transform_indices = @transform_3, window_bounds = array<i64: 2, 6, 8, 128>}, {transform_indices = @transform_4, window_bounds = array<i64: 4>}, {transform_indices = @transform_5, window_bounds = array<i64: 2, 6, 8, 128>}]} {
    %c0 = arith.constant 0 : index
    %c0_0 = arith.constant 0 : index
    %c0_1 = arith.constant 0 : index
    %0 = vector.load %arg3[%c0, %c0_0, %c0_1] : memref<6x16x16xbf16, #tpu.memory_space<vmem>>, vector<6x16x16xbf16>
    %c2_i32 = arith.constant 2 : i32
    %1 = arith.muli %arg0, %c2_i32 : i32
    %c0_2 = arith.constant 0 : index
    %c0_3 = arith.constant 0 : index
    %c0_4 = arith.constant 0 : index
    %2 = vector.load %arg1[%c0_2, %c0_3, %c0_4] : memref<2x8x16xbf16, #tpu.memory_space<vmem>>, vector<1x8x16xbf16>
    %3 = vector.shape_cast %2 : vector<1x8x16xbf16> to vector<8x16xbf16>
    %4 = vector.shape_cast %3 : vector<8x16xbf16> to vector<1x8x16xbf16>
    %5 = vector.broadcast %4 : vector<1x8x16xbf16> to vector<6x8x16xbf16>
    %c0_5 = arith.constant 0 : index
    %c0_6 = arith.constant 0 : index
    %c0_7 = arith.constant 0 : index
    %6 = vector.load %arg2[%c0_5, %c0_6, %c0_7] : memref<2x16x128xbf16, #tpu.memory_space<vmem>>, vector<1x16x128xbf16>
    %7 = vector.shape_cast %6 : vector<1x16x128xbf16> to vector<16x128xbf16>
    %8 = vector.shape_cast %7 : vector<16x128xbf16> to vector<1x16x128xbf16>
    %9 = vector.broadcast %8 : vector<1x16x128xbf16> to vector<6x16x128xbf16>
    "tpu.trace_start"() <{level = 10 : i32, message = "bth,bhw->btw"}> : () -> ()
    %cst = arith.constant dense<0.000000e+00> : vector<6x8x16xf32>
    %10 = tpu.matmul %5, %0, %cst {dimension_numbers = #tpu.dot_dimension_numbers<[2], [1], [1], [2], [0, 0, 0, 1, 1, 2], [0], [0]>} : vector<6x8x16xbf16>, vector<6x16x16xbf16>, vector<6x8x16xf32> -> vector<6x8x16xf32>
    "tpu.trace_stop"() : () -> ()
    %11 = arith.truncf %10 : vector<6x8x16xf32> to vector<6x8x16xbf16>
    "tpu.trace_start"() <{level = 10 : i32, message = "btw,bwu->btu"}> : () -> ()
    %cst_8 = arith.constant dense<0.000000e+00> : vector<6x8x128xf32>
    %12 = tpu.matmul %11, %9, %cst_8 {dimension_numbers = #tpu.dot_dimension_numbers<[2], [1], [1], [2], [0, 0, 0, 1, 1, 2], [0], [0]>} : vector<6x8x16xbf16>, vector<6x16x128xbf16>, vector<6x8x128xf32> -> vector<6x8x128xf32>
    "tpu.trace_stop"() : () -> ()
    %c0_i32 = arith.constant 0 : i32
    %13 = arith.addi %1, %c0_i32 : i32
    %14 = arith.index_cast %13 : i32 to index
    %15 = memref.load %arg5[%14] : memref<4xf32, #tpu.memory_space<smem>>
    %c0_9 = arith.constant 0 : index
    %c0_10 = arith.constant 0 : index
    %c0_11 = arith.constant 0 : index
    %c0_12 = arith.constant 0 : index
    %16 = vector.load %arg4[%c0_9, %c0_10, %c0_11, %c0_12] : memref<2x6x8x128xbf16, #tpu.memory_space<vmem>>, vector<1x6x8x128xbf16>
    %17 = vector.shape_cast %16 : vector<1x6x8x128xbf16> to vector<6x8x128xbf16>
    %18 = arith.extf %17 : vector<6x8x128xbf16> to vector<6x8x128xf32>
    %19 = vector.broadcast %15 : f32 to vector<6x8x128xf32>
    %20 = arith.mulf %19, %18 : vector<6x8x128xf32>
    %21 = arith.addf %12, %20 : vector<6x8x128xf32>
    %c0_13 = arith.constant 0 : index
    %c0_14 = arith.constant 0 : index
    %c0_15 = arith.constant 0 : index
    %c0_16 = arith.constant 0 : index
    %22 = vector.load %arg6[%c0_13, %c0_14, %c0_15, %c0_16] : memref<2x6x8x128xf32, #tpu.memory_space<vmem>>, vector<1x6x8x128xf32>
    %23 = vector.shape_cast %22 : vector<1x6x8x128xf32> to vector<6x8x128xf32>
    %24 = vector.shape_cast %21 : vector<6x8x128xf32> to vector<1x6x8x128xf32>
    tpu.vector_store %arg6[%c0_13, %c0_14, %c0_15, %c0_16], %24 {strides = array<i32>} : memref<2x6x8x128xf32, #tpu.memory_space<vmem>>, vector<1x6x8x128xf32>,
    %c1 = arith.constant 1 : index
    %c0_17 = arith.constant 0 : index
    %c0_18 = arith.constant 0 : index
    %25 = vector.load %arg1[%c1, %c0_17, %c0_18] : memref<2x8x16xbf16, #tpu.memory_space<vmem>>, vector<1x8x16xbf16>
    %26 = vector.shape_cast %25 : vector<1x8x16xbf16> to vector<8x16xbf16>
    %27 = vector.shape_cast %26 : vector<8x16xbf16> to vector<1x8x16xbf16>
    %28 = vector.broadcast %27 : vector<1x8x16xbf16> to vector<6x8x16xbf16>
    %c1_19 = arith.constant 1 : index
    %c0_20 = arith.constant 0 : index
    %c0_21 = arith.constant 0 : index
    %29 = vector.load %arg2[%c1_19, %c0_20, %c0_21] : memref<2x16x128xbf16, #tpu.memory_space<vmem>>, vector<1x16x128xbf16>
    %30 = vector.shape_cast %29 : vector<1x16x128xbf16> to vector<16x128xbf16>
    %31 = vector.shape_cast %30 : vector<16x128xbf16> to vector<1x16x128xbf16>
    %32 = vector.broadcast %31 : vector<1x16x128xbf16> to vector<6x16x128xbf16>
    "tpu.trace_start"() <{level = 10 : i32, message = "bth,bhw->btw"}> : () -> ()
    %cst_22 = arith.constant dense<0.000000e+00> : vector<6x8x16xf32>
    %33 = tpu.matmul %28, %0, %cst_22 {dimension_numbers = #tpu.dot_dimension_numbers<[2], [1], [1], [2], [0, 0, 0, 1, 1, 2], [0], [0]>} : vector<6x8x16xbf16>, vector<6x16x16xbf16>, vector<6x8x16xf32> -> vector<6x8x16xf32>
    "tpu.trace_stop"() : () -> ()
    %34 = arith.truncf %33 : vector<6x8x16xf32> to vector<6x8x16xbf16>
    "tpu.trace_start"() <{level = 10 : i32, message = "btw,bwu->btu"}> : () -> ()
    %cst_23 = arith.constant dense<0.000000e+00> : vector<6x8x128xf32>
    %35 = tpu.matmul %34, %32, %cst_23 {dimension_numbers = #tpu.dot_dimension_numbers<[2], [1], [1], [2], [0, 0, 0, 1, 1, 2], [0], [0]>} : vector<6x8x16xbf16>, vector<6x16x128xbf16>, vector<6x8x128xf32> -> vector<6x8x128xf32>
    "tpu.trace_stop"() : () -> ()
    %c1_i32 = arith.constant 1 : i32
    %36 = arith.addi %1, %c1_i32 : i32
    %37 = arith.index_cast %36 : i32 to index
    %38 = memref.load %arg5[%37] : memref<4xf32, #tpu.memory_space<smem>>
    %c1_24 = arith.constant 1 : index
    %c0_25 = arith.constant 0 : index
    %c0_26 = arith.constant 0 : index
    %c0_27 = arith.constant 0 : index
    %39 = vector.load %arg4[%c1_24, %c0_25, %c0_26, %c0_27] : memref<2x6x8x128xbf16, #tpu.memory_space<vmem>>, vector<1x6x8x128xbf16>
    %40 = vector.shape_cast %39 : vector<1x6x8x128xbf16> to vector<6x8x128xbf16>
    %41 = arith.extf %40 : vector<6x8x128xbf16> to vector<6x8x128xf32>
    %42 = vector.broadcast %38 : f32 to vector<6x8x128xf32>
    %43 = arith.mulf %42, %41 : vector<6x8x128xf32>
    %44 = arith.addf %35, %43 : vector<6x8x128xf32>
    %c1_28 = arith.constant 1 : index
    %c0_29 = arith.constant 0 : index
    %c0_30 = arith.constant 0 : index
    %c0_31 = arith.constant 0 : index
    %45 = vector.load %arg6[%c1_28, %c0_29, %c0_30, %c0_31] : memref<2x6x8x128xf32, #tpu.memory_space<vmem>>, vector<1x6x8x128xf32>
    %46 = vector.shape_cast %45 : vector<1x6x8x128xf32> to vector<6x8x128xf32>
    %47 = vector.shape_cast %44 : vector<6x8x128xf32> to vector<1x6x8x128xf32>
    tpu.vector_store %arg6[%c1_28, %c0_29, %c0_30, %c0_31], %47 {strides = array<i32>} : memref<2x6x8x128xf32, #tpu.memory_space<vmem>>, vector<1x6x8x128xf32>,
    return
  }
  func.func @transform_0(%arg0: i32) -> (i32, i32, i32) {
    %c0_i32 = arith.constant 0 : i32
    %c0_i32_0 = arith.constant 0 : i32
    %c0_i32_1 = arith.constant 0 : i32
    return %arg0, %c0_i32, %c0_i32_0 : i32, i32, i32
  }
  func.func @transform_1(%arg0: i32) -> (i32, i32, i32) {
    %c0_i32 = arith.constant 0 : i32
    %c0_i32_0 = arith.constant 0 : i32
    %c0_i32_1 = arith.constant 0 : i32
    return %arg0, %c0_i32, %c0_i32_0 : i32, i32, i32
  }
  func.func @transform_2(%arg0: i32) -> (i32, i32, i32) {
    %c0_i32 = arith.constant 0 : i32
    %c0_i32_0 = arith.constant 0 : i32
    %c0_i32_1 = arith.constant 0 : i32
    %c0_i32_2 = arith.constant 0 : i32
    return %c0_i32, %c0_i32_0, %c0_i32_1 : i32, i32, i32
  }
  func.func @transform_3(%arg0: i32) -> (i32, i32, i32, i32) {
    %c0_i32 = arith.constant 0 : i32
    %c0_i32_0 = arith.constant 0 : i32
    %c0_i32_1 = arith.constant 0 : i32
    %c0_i32_2 = arith.constant 0 : i32
    return %arg0, %c0_i32, %c0_i32_0, %c0_i32_1 : i32, i32, i32, i32
  }
  func.func @transform_4(%arg0: i32) -> i32 {
    %c0_i32 = arith.constant 0 : i32
    %c0_i32_0 = arith.constant 0 : i32
    return %c0_i32 : i32
  }
  func.func @transform_5(%arg0: i32) -> (i32, i32, i32, i32) {
    %c0_i32 = arith.constant 0 : i32
    %c0_i32_0 = arith.constant 0 : i32
    %c0_i32_1 = arith.constant 0 : i32
    %c0_i32_2 = arith.constant 0 : i32
    return %arg0, %c0_i32, %c0_i32_0, %c0_i32_1 : i32, i32, i32, i32
  }
}

</mosaic_0001>

<bundles_post_ra>
// kernel: tpu_custom_call.1
= control target key start
LH: loop header
LB: loop body
LE: loop exit
PB: predicated region body
PF: predicated region fallthrough
CT: control target
= control target key end

     0   :  { %s1763_s0 = inlined_call_operand.hbm [shape: bf16[4,8,16], index: 0, kind: input, shape index: {}]   ;;  %s1764_s1 = inlined_call_operand.hbm [shape: bf16[4,16,128], index: 1, kind: input, shape index: {}]   ;;  %s1765_s2 = inlined_call_operand.hbm [shape: bf16[6,16,16], index: 2, kind: input, shape index: {}]   ;;  %s1766_s3 = inlined_call_operand.hbm [shape: bf16[4,6,8,128], index: 3, kind: input, shape index: {}]   ;;  %s1767_s4 = inlined_call_operand.vmem [shape: f32[4], index: 4, kind: input, shape index: {}]   ;;  %s1768_s5 = inlined_call_operand.hbm [shape: f32[4,6,8,128], index: 5, kind: output, shape index: {}]  }
   0x1   :  { %1776 = sst [smem:[#allocation22_spill]] %s1765_s2 }
   0x2   :  { %1777 = sst [smem:[#allocation23_spill]] %s1767_s4 }
   0x3   :  { %10 = vsyncpa [#allocation3], 0 }
   0x4   :  { %12 = vsyncpa [#allocation3 + $0x1], 0 }
   0x5   :  { %13 = vsyncpa [#allocation7], 0 }
   0x6   :  { %15 = vsyncpa [#allocation7 + $0x1], 0 }
   0x7   :  { %16 = vsyncpa [#allocation10], 0 }
   0x8   :  { %18 = vsyncpa [#allocation10 + $0x1], 0 }
   0x9   :  { %19 = vsyncpa [#allocation5], 0 }
   0xa   :  { %20 = vsyncpa [#allocation4], 0 }
   0xb   :  { %22 = vsyncpa [#allocation4 + $0x1], 0  ;;  %s1492_s18 = smov 0   ;;  %s1494_s19 = smov 0  }
   0xc   :  { %s1496_s20 = smov 0   ;;  %s1498_s21 = smov 0  }
   0xd LB: > { %1778 = sst [smem:[#allocation19_spill]] %s1450_s20  ;;  %s1513_s22 = sadd.s32 4294967295, %s1454_s21   ;;  %s1454_s21 = sphi %s1498_s21, %s1791_s21   ;;  %s1450_s20 = sphi %s1496_s20, %s1793_s20   ;;  %s1446_s19 = sphi %s1494_s19, %s1795_s19   ;;  %s1442_s18 = sphi %s1492_s18, %s1794_s18  }
   0xe   : > { %s1014_s23 = sadd.s32 4294967294, %s1454_s21   ;;  %p48_p0 = scmp.ne.s32.totalorder %s1446_s19, %s1442_s18 }
   0xf   : > { %p49_p1 = scmp.eq.s32.totalorder %s1513_s22, 0  ;;  %p166_p2 = scmp.eq.s32.totalorder %s1513_s22, 1 }
  0x10   : > { %p172_p3 = scmp.eq.s32.totalorder %s1014_s23, 1  ;;  %p1015_p5 = scmp.ge.s32.totalorder %s1454_s21, 1 }
  0x11   : > { %p1522_p4 = por %p49_p1, %p48_p0  ;;  %p179_p7 = scmp.lt.s32.totalorder %s1454_s21, 3 }
  0x12   : > { %p1527_p6 = por %p172_p3, %p48_p0  ;;  %s1781_s2 = sld [smem:[#allocation22_spill]] }
  0x13   : > { %p1535_p8 = pnand %p1015_p5, %p179_p7  ;;  %s1456_s30 = smov [#allocation8]  }
  0x14   : > { %s192_s6 = sshll.u32 %s1456_s30, 4  ;;  %s1783_s4 = sld [smem:[#allocation23_spill]]  ;;  %s193_s6 = int_to_ptr.vmem [resolvable:$true] %s192_s6 }
  0x15   : > { %p1172_p9 = pneg %p1535_p8  ;;  %s1769_s10 = smov 64  }
  0x16   : > { %s1771_s11 = smov 4   ;;  %s1459_s12 = smov [#allocation11]  }
  0x17   : > { %p1173_p10 = pnand %p1172_p9, %p49_p1  ;;  %s1551_s13 = sadd.s32 1, %s1454_s21  }
  0x18   : > { %s190_s28 = sshll.u32 %s1781_s2, 4  ;;  %1784 = sst [smem:[#allocation20_spill]] %s1551_s13  ;;  %s191_s28 = int_to_ptr.hbm [resolvable:$true] %s190_s28 }
  0x19   : > { %1175 = dma.hbm_to_vmem [thread:$0]  (!%p1173_p10), %s191_s28, 768, %s193_s6, [#allocation7], %s1769_s10, %s1769_s10, %s1771_s11  }
  0x1a   : > { %s205_s9 = sshll.u32 %s1783_s4, 4  ;;  %s32_s14 = ssub.s32 %s1454_s21, %s1551_s13  ;;  %s206_s9 = int_to_ptr.vmem [resolvable:$true] %s205_s9 }
  0x1b   : > { %1178 = dma.vmem_to_smem (!%p1173_p10), %s206_s9, 16, %s1459_s12, [#allocation5]  }
  0x1c   : > { %p33_p12 = scmp.eq.s32.totalorder %s32_s14, 0  ;;  %s35_s15 = sadd.s32 1, %s1450_s20 }
  0x1d   : > { %p42_p13 = scmp.ne.s32.totalorder %s1450_s20, %s1446_s19  ;;  %p43_p0 = scmp.eq.s32.totalorder %s1454_s21, 0 }
  0x1e   : > { %s1560_s16 = scalar_select %p33_p12, %s1450_s20, %s35_s15  }
  0x1f   : > { %p44_p3 = por %p43_p0, %p42_p13  ;;  %p1564_p5 = por %p166_p2, %p42_p13 }
  0x20   : > { %1785 = sst [smem:[#allocation21_spill]] %s1560_s16  ;;  %p1195_p7 = scmp.lt.s32.totalorder %s1454_s21, 2 }
  0x21   : > { %s1570_s23 = sand.u32 1, %s1450_s20   ;;  %s1111_s27 = sshll.u32 %s1454_s21, 3 }
  0x22   : > { %s1019_s26 = sshll.u32 %s1570_s23, 3  ;;  %s225_s6 = scalar_lea.hbm %s1763_s0, %s1111_s27 }
  0x23   : > { %s220_s7 = scalar_lea.vmem [#allocation2], %s1019_s26  ;;  %s226_s9 = sshll.u32 %s225_s6, 4  ;;  %s227_s9 = int_to_ptr.hbm [resolvable:$true] %s226_s9 }
  0x24   : > { %s228_s8 = sshll.u32 %s220_s7, 4  ;;  %p1577_p2 = pnand %p1195_p7, %p44_p3  ;;  %s229_s8 = int_to_ptr.vmem [resolvable:$true] %s228_s8 }
  0x25   : > { %s238_s14 = sand.u32 1, %s1454_s21   ;;  %s1022_s15 = sshll.u32 %s1570_s23, 4 }
  0x26   : > { %s217_s10 = scalar_lea.sflag [#allocation3], %s1570_s23  ;;  %s1282_s11 = sshra.s32 %s227_s9, 4  ;;  %s1283_s11 = int_to_ptr.hbm [resolvable:$true] %s1282_s11 }
  0x27   : > { %s1284_s2 = scalar_lea.hbm %s1283_s11, 8  ;;  %p1286_p10 = pneg %p1577_p2 }
  0x28   : > { %p1285_p9 = scmp.ne.s32.totalorder %s1283_s11, %s1284_s2  ;;  %s1289_s28 = scalar_lea.hbm %s1763_s0, 16 }
  0x29   : > { %p1290_p0 = scmp.lt.s32.totalorder %s1283_s11, %s1763_s0  ;;  %p1291_p3 = scmp.lt.s32.totalorder %s1289_s28, %s1284_s2 }
  0x2a   : > { %p1287_p12 = pnand %p1286_p10, %p1285_p9 }
  0x2b   : > { %p1292_p7 = por %p1291_p3, %p1290_p0 }
  0x2c   : > { %p1288_p13 = pneg %p1287_p12 }
  0x2e   : > { %p1293_p11 = pnand %p1292_p7, %p1288_p13 }
  0x30   : > { %1296 = shalt.err (!%p1293_p11)
}
  0x31   : > { %s1788_s7 = smov 4   ;;  %s1789_s4 = smov 64  }
  0x32   : > { %1182 = dma.hbm_to_vmem [thread:$0]  (!%p1577_p2), %s227_s9, 128, %s229_s8, %s217_s10, %s1789_s4, %s1789_s4, %s1788_s7  }
  0x33   : > { %s1113_s16 = sshll.u32 %s1454_s21, 4  ;;  %s242_s13 = scalar_lea.vmem [#allocation6], %s1022_s15 }
  0x34   : > { %s248_s27 = scalar_lea.hbm %s1764_s1, %s1113_s16  ;;  %s251_s30 = sshll.u32 %s242_s13, 4  ;;  %s252_s30 = int_to_ptr.vmem [resolvable:$true] %s251_s30 }
  0x35   : > { %s249_s11 = sshll.u32 %s248_s27, 4  ;;  %s239_s2 = scalar_lea.sflag [#allocation7], %s238_s14  ;;  %s250_s11 = int_to_ptr.hbm [resolvable:$true] %s249_s11 }
  0x36   : > { %s1312_s28 = sshra.s32 %s250_s11, 4  ;;  %s1319_s9 = scalar_lea.hbm %s1764_s1, 32  ;;  %s1313_s28 = int_to_ptr.hbm [resolvable:$true] %s1312_s28 }
  0x37   : > { %s1314_s6 = scalar_lea.hbm %s1313_s28, 16  ;;  %p1320_p13 = scmp.lt.s32.totalorder %s1313_s28, %s1764_s1 }
  0x38   : > { %p1315_p11 = scmp.ne.s32.totalorder %s1313_s28, %s1314_s6  ;;  %p1321_p0 = scmp.lt.s32.totalorder %s1319_s9, %s1314_s6 }
  0x3a   : > { %p1317_p9 = pnand %p1315_p11, %p1286_p10  ;;  %p1322_p3 = por %p1321_p0, %p1320_p13 }
  0x3c   : > { %p1318_p12 = pneg %p1317_p9 }
  0x3e   : > { %p1323_p7 = pnand %p1322_p3, %p1318_p12 }
  0x40   : > { %1326 = shalt.err (!%p1323_p7)
}
  0x41   : > { %1185 = dma.hbm_to_vmem [thread:$0]  (!%p1577_p2), %s250_s11, 256, %s252_s30, %s239_s2, %s1789_s4, %s1789_s4, %s1788_s7  }
  0x42   : > { %s1151_s13 = smul.u32 48, %s1570_s23  ;;  %s262_s8 = scalar_lea.sflag [#allocation10], %s1570_s23 }
  0x43   : > { %s1152_s14 = smul.u32 48, %s1454_s21  ;;  %s1349_s2 = scalar_lea.hbm %s1766_s3, 96 }
  0x44   : > { %s265_s28 = scalar_lea.vmem [#allocation9], %s1151_s13 }
  0x45   : > { %s271_s27 = scalar_lea.hbm %s1766_s3, %s1152_s14  ;;  %s274_s6 = sshll.u32 %s265_s28, 4  ;;  %s275_s6 = int_to_ptr.vmem [resolvable:$true] %s274_s6 }
  0x46   : > { %s272_s10 = sshll.u32 %s271_s27, 4  ;;  %s273_s10 = int_to_ptr.hbm [resolvable:$true] %s272_s10 }
  0x47   : > { %s1342_s9 = sshra.s32 %s273_s10, 4  ;;  %s1343_s9 = int_to_ptr.hbm [resolvable:$true] %s1342_s9 }
  0x48   : > { %s1344_s20 = scalar_lea.hbm %s1343_s9, 48  ;;  %p1350_p13 = scmp.lt.s32.totalorder %s1343_s9, %s1766_s3 }
  0x49   : > { %p1345_p11 = scmp.ne.s32.totalorder %s1343_s9, %s1344_s20  ;;  %p1351_p0 = scmp.lt.s32.totalorder %s1349_s2, %s1344_s20 }
  0x4b   : > { %p1347_p9 = pnand %p1345_p11, %p1286_p10  ;;  %p1352_p3 = por %p1351_p0, %p1350_p13 }
  0x4d   : > { %p1348_p12 = pneg %p1347_p9 }
  0x4f   : > { %p1353_p7 = pnand %p1352_p3, %p1348_p12 }
  0x51   : > { %1356 = shalt.err (!%p1353_p7)
}
  0x52   : > { %1188 = dma.hbm_to_vmem [thread:$0]  (!%p1577_p2), %s273_s10, 768, %s275_s6, %s262_s8, %s1789_s4, %s1789_s4, %s1788_s7  }
  0x53   : > { %286 = sbr.rel (%p1535_p8) target bundleno = 542 (0x21e), region = 40  ;;  %s1641_s23 = sand.u32 (!%p1535_p8), 1, %s1446_s19  }
  0x54   : > { %s1030_s13 = sshll.u32 (!%p1535_p8), %s1641_s23, 3  ;;  %s289_s15 = scalar_lea.sflag (!%p1535_p8), [#allocation3], %s1641_s23 }
  0x55   : > { %s1645_s26 = scalar_lea.vmem (!%p1535_p8), [#allocation2], %s1030_s13 }
  0x58   : > { %1417 = dma.done.wait (%p1522_p4), %s289_s15, 128  }
  0x59   : > { %1419 = vsyncadd (%p1522_p4), %s289_s15, 4294967168  ;;  %s298_s4 = sand.u32 1, %s1513_s22   ;;  %s1031_s29 = sshll.u32 %s1641_s23, 4 }
  0x5a   : > { %s299_s12 = scalar_lea.sflag [#allocation7], %s298_s4  ;;  %s1653_s7 = scalar_lea.vmem [#allocation6], %s1031_s29 }
  0x5b   : > { %1421 = dma.done.wait (%p1522_p4), %s299_s12, 256  }
  0x5c   : > { %1423 = vsyncadd (%p1522_p4), %s299_s12, 4294967040 }
  0x5d   : > { %1425 = dma.done.wait (%p49_p1), [#allocation7], 768  }
  0x5e   : > { %1427 = vsyncadd (%p49_p1), [#allocation7], 4294966528  ;;  %s1153_s27 = smul.u32 48, %s1641_s23  ;;  %s314_s28 = scalar_lea.sflag [#allocation10], %s1641_s23 }
  0x60   : > { %s1665_s6 = scalar_lea.vmem [#allocation9], %s1153_s27 }
  0x61   : > { %1429 = dma.done.wait (%p1522_p4), %s314_s28, 768  }
  0x62   : > { %1431 = vsyncadd (%p1522_p4), %s314_s28, 4294966528 }
  0x63   : > { %1433 = dma.done.wait (%p49_p1), [#allocation5], 16  }
  0x64   : > { %1435 = vsyncadd (%p49_p1), [#allocation5], 4294967280 }
  0x65   : > { %328 = sfence }
  0x66   : > { %v1114_v0 = vld [vmem:[#allocation8] sm:$0xff]  ;;  %v1115_v1 = vld [vmem:[#allocation8 + $0x8] sm:$0xff]  ;;  %v1116_v2 = vld [vmem:[#allocation8 + $0x10] sm:$0xff]  ;;  %vm388_vm0 = vcmask 130048   ;;  %s1034_s24 = sshll.u32 %s1513_s22, 1  ;;  %s1154_s8 = smul.u32 96, %s1641_s23 }
  0x67   : > { %v1117_v3 = vld [vmem:[#allocation8 + $0x18] sm:$0xff]  ;;  %v1118_v4 = vld [vmem:[#allocation8 + $0x20] sm:$0xff]  ;;  %399 = vmatpush.bf16.msra.mxu0 %v1114_v0  ;;  %418 = vmatpush.bf16.msra.mxu1 %v1115_v1  ;;  %v1119_v6 = vld [vmem:[#allocation8 + $0x28] sm:$0xff]  ;;  %s506_s10 = sld [smem:[#allocation11 + %s1034_s24]]  ;;  %s726_s20 = sadd.s32 1, %s1034_s24 }
  0x68   : > { %v379_v5 = vld [vmem:[%s1645_s26] sm:$0xf]  ;;  %437 = vmatpush.bf16.msra.mxu2 %v1116_v2  ;;  %456 = vmatpush.bf16.msra.mxu3 %v1117_v3  ;;  %v1120_v7 = vld [vmem:[%s1653_s7] sm:$0xff]  ;;  %v1075_v24 = vld [vmem:[%s1645_s26 + $0x4] sm:$0xf]  ;;  %s1703_s9 = scalar_lea.vmem [#allocation12], %s1154_s8 }
  0x69   : > { %v1121_v27 = vld [vmem:[%s1653_s7 + $0x8] sm:$0xff]  ;;  %v1123_v28 = vld [vmem:[%s1665_s6] sm:$0xff]   ;;  %v1146_v29 = vld [vmem:[%s1665_s6 + $0x8] sm:$0xff]   ;;  %s727_s30 = sld [smem:[#allocation11 + %s726_s20]]  ;;  %s1155_s11 = smul.u32 96, %s1513_s22 }
  0x6a   : > { %1039 = vmatmul.msk.bf16.vlgmr.msra.gmra.mxu0 %vm388_vm0, %v379_v5  ;;  %1044 = vmatmul.msk.bf16.vlgmr.msra.gmra.mxu1 %vm388_vm0, %v379_v5  ;;  %v1124_v30 = vunpack.c.l.bf16 %v1123_v28  ;;  %v1125_v31 = vunpack.c.h.bf16 %v1123_v28  ;;  %v1128_v32 = vunpack.c.l.bf16 %v1146_v29  ;;  %v1129_v33 = vunpack.c.h.bf16 %v1146_v29  ;;  %v1147_v47 = vld [vmem:[%s1665_s6 + $0x10] sm:$0xff]   ;;  %s871_s22 = sshll.u32 %s1703_s9, 4  ;;  %s858_s15 = scalar_lea.sflag [#allocation4], %s1641_s23  ;;  %s872_s22 = int_to_ptr.vmem [resolvable:$true] %s871_s22 }
  0x6b   : > { %475 = vmatpush.bf16.msrb.mxu0 %v1118_v4  ;;  %494 = vmatpush.bf16.msrb.mxu1 %v1119_v6  ;;  %v1132_v52 = vunpack.c.l.bf16 %v1147_v47  ;;  %v1133_v53 = vunpack.c.h.bf16 %v1147_v47  ;;  %s870_s14 = scalar_lea.hbm %s1768_s5, %s1155_s11  ;;  %s1392_s7 = scalar_lea.hbm %s1768_s5, 192 }
  0x6c   : > { %1049 = vmatmul.msk.bf16.vlgmr.msra.gmra.mxu2 %vm388_vm0, %v379_v5  ;;  %1054 = vmatmul.msk.bf16.vlgmr.msra.gmra.mxu3 %vm388_vm0, %v379_v5  ;;  %s873_s13 = sshll.u32 %s870_s14, 4  ;;  %s874_s13 = int_to_ptr.hbm [resolvable:$true] %s873_s13 }
  0x6d   : > { %542 = vmatpush.bf16.msrb.mxu2 %v1120_v7  ;;  %558 = vmatpush.bf16.msrb.mxu3 %v1120_v7  ;;  %v519_v34 = vstv %s506_s10  ;;  %s1386_s26 = sshra.s32 %s874_s13, 4  ;;  %s1387_s26 = int_to_ptr.hbm [resolvable:$true] %s1386_s26 }
  0x6e   : > { %v520_v35 = vmul.f32 %v1124_v30, %v519_v34  ;;  %v521_v36 = vmul.f32 %v1125_v31, %v519_v34  ;;  %v522_v37 = vmul.f32 %v1128_v32, %v519_v34  ;;  %v523_v38 = vmul.f32 %v1129_v33, %v519_v34  ;;  %v1150_v31 = vld [vmem:[%s1665_s6 + $0x28] sm:$0xff]   ;;  %s1388_s4 = scalar_lea.hbm %s1387_s26, 96  ;;  %p1393_p2 = scmp.lt.s32.totalorder %s1387_s26, %s1768_s5 }
  0x6f   : > { %574 = vmatpush.bf16.msra.mxu0 %v1120_v7  ;;  %590 = vmatpush.bf16.msra.mxu1 %v1120_v7  ;;  %v524_v54 = vmul.f32 %v1132_v52, %v519_v34  ;;  %v525_v55 = vmul.f32 %v1133_v53, %v519_v34  ;;  %p1389_p1 = scmp.ne.s32.totalorder %s1387_s26, %s1388_s4  ;;  %p1394_p10 = scmp.lt.s32.totalorder %s1392_s7, %s1388_s4 }
  0x71   : > { %606 = vmatpush.bf16.msra.mxu2 %v1120_v7  ;;  %622 = vmatpush.bf16.msra.mxu3 %v1120_v7  ;;  %p1390_p4 = pnand %p1389_p1, %p1564_p5  ;;  %p1395_p11 = por %p1394_p10, %p1393_p2 }
  0x73   : > { %p1391_p8 = pneg %p1390_p4 }
  0x75   : > { %p1396_p9 = pnand %p1395_p11, %p1391_p8 }
  0x7a   : > { %1059 = vmatmul.msk.bf16.vlgmr.msrb.gmra.mxu0 %vm388_vm0, %v379_v5  ;;  %1064 = vmatmul.msk.bf16.vlgmr.msrb.gmra.mxu1 %vm388_vm0, %v379_v5 }
  0x7b   : > { %649 = vmatpush.bf16.msrb.mxu0 %v1114_v0  ;;  %662 = vmatpush.bf16.msrb.mxu1 %v1115_v1 }
  0xe7   : > { %v401_v8 = vpop.f32.mrf.mxu0  ;;  %v420_v9 = vpop.f32.mrf.mxu1 }
  0xe8   : > { %v500_v10 = vpack.c.bf16 %v401_v8, %v401_v8  ;;  %v501_v11 = vpack.c.bf16 %v420_v9, %v420_v9 }
  0xea   : > { %1069 = vmatmul.msk.bf16.vlgmr.msrb.gmra.mxu2 %vm388_vm0, %v500_v10  ;;  %1070 = vmatmul.msk.bf16.vlgmr.msrb.gmra.mxu3 %vm388_vm0, %v501_v11 }
  0xeb   : > { %675 = vmatpush.bf16.msrb.mxu2 %v1116_v2  ;;  %688 = vmatpush.bf16.msrb.mxu3 %v1117_v3 }
  0xef   : > { %v439_v12 = vpop.f32.mrf.mxu2  ;;  %v458_v13 = vpop.f32.mrf.mxu3 }
  0xf0   : > { %v502_v14 = vpack.c.bf16 %v439_v12, %v439_v12  ;;  %v503_v15 = vpack.c.bf16 %v458_v13, %v458_v13  ;;  %v403_v16 = vpop.f32.mrf.mxu0  ;;  %v422_v17 = vpop.f32.mrf.mxu1 }
  0xf1   : > { %v1148_v16 = vld [vmem:[%s1665_s6 + $0x18] sm:$0xff]  }
  0xf2   : > { %1071 = vmatmul.msk.bf16.vlgmr.msra.gmra.mxu0 %vm388_vm0, %v502_v14  ;;  %1072 = vmatmul.msk.bf16.vlgmr.msra.gmra.mxu1 %vm388_vm0, %v503_v15  ;;  %v1136_v17 = vunpack.c.l.bf16 %v1148_v16 }
  0xf3   : > { %701 = vmatpush.bf16.msra.mxu0 %v1118_v4  ;;  %714 = vmatpush.bf16.msra.mxu1 %v1119_v6 }
  0xf7   : > { %v441_v18 = vpop.f32.mrf.mxu2  ;;  %v460_v19 = vpop.f32.mrf.mxu3 }
  0xf8   : > { %v477_v20 = vpop.f32.mrf.mxu0  ;;  %v496_v21 = vpop.f32.mrf.mxu1  ;;  %v1137_v18 = vunpack.c.h.bf16 %v1148_v16  ;;  %v741_v19 = vstv %s727_s30 }
  0xf9   : > { %v504_v22 = vpack.c.bf16 %v477_v20, %v477_v20  ;;  %v505_v23 = vpack.c.bf16 %v496_v21, %v496_v21  ;;  %v742_v20 = vmul.f32 %v1136_v17, %v741_v19 }
  0xfa   : > { %v743_v21 = vmul.f32 %v1137_v18, %v741_v19 }
  0xfb   : > { %1073 = vmatmul.msk.bf16.vlgmr.msra.gmra.mxu2 %vm388_vm0, %v504_v22  ;;  %1074 = vmatmul.msk.bf16.vlgmr.msra.gmra.mxu3 %vm388_vm0, %v505_v23  ;;  %v1149_v22 = vld [vmem:[%s1665_s6 + $0x20] sm:$0xff]  }
  0xfc   : > { %764 = vmatpush.bf16.msra.mxu2 %v1121_v27  ;;  %780 = vmatpush.bf16.msra.mxu3 %v1121_v27  ;;  %v1141_v28 = vunpack.c.h.bf16 %v1149_v22 }
  0xfe   : > { %v745_v30 = vmul.f32 %v1141_v28, %v741_v19 }
 0x100   : > { %v479_v25 = vpop.f32.mrf.mxu0  ;;  %v498_v26 = vpop.f32.mrf.mxu1 }
 0x102   : > { %1078 = vmatmul.msk.bf16.vlgmr.msrb.gmra.mxu0 %vm388_vm0, %v1075_v24  ;;  %1079 = vmatmul.msk.bf16.vlgmr.msrb.gmra.mxu1 %vm388_vm0, %v1075_v24 }
 0x103   : > { %796 = vmatpush.bf16.msrb.mxu0 %v1121_v27  ;;  %812 = vmatpush.bf16.msrb.mxu1 %v1121_v27 }
 0x10b   : > { %1080 = vmatmul.msk.bf16.vlgmr.msrb.gmra.mxu2 %vm388_vm0, %v1075_v24  ;;  %1081 = vmatmul.msk.bf16.vlgmr.msrb.gmra.mxu3 %vm388_vm0, %v1075_v24 }
 0x10c   : > { %828 = vmatpush.bf16.msrb.mxu2 %v1121_v27  ;;  %844 = vmatpush.bf16.msrb.mxu3 %v1121_v27  ;;  %v1140_v27 = vunpack.c.l.bf16 %v1149_v22 }
 0x10e   : > { %v744_v29 = vmul.f32 %v1140_v27, %v741_v19 }
 0x112   : > { %1082 = vmatmul.msk.bf16.vlgmr.msra.gmra.mxu0 %vm388_vm0, %v1075_v24  ;;  %1083 = vmatmul.msk.bf16.vlgmr.msra.gmra.mxu1 %vm388_vm0, %v1075_v24 }
 0x16d   : > { %v544_v39 = vpop.f32.mrf.mxu2  ;;  %v560_v40 = vpop.f32.mrf.mxu3 }
 0x16e   : > { %v545_v41 = vadd.f32 %v544_v39, %v520_v35  ;;  %v561_v42 = vadd.f32 %v560_v40, %v521_v36  ;;  %v1144_v36 = vunpack.c.l.bf16 %v1150_v31 }
 0x16f   : > { %v576_v43 = vpop.f32.mrf.mxu0  ;;  %v592_v44 = vpop.f32.mrf.mxu1 }
 0x170   : > { %v577_v45 = vadd.f32 %v576_v43, %v522_v37  ;;  %v593_v46 = vadd.f32 %v592_v44, %v523_v38  ;;  %628 = vst [vmem:[%s1703_s9] sm:$0xff] %v545_v41  ;;  %v1145_v37 = vunpack.c.h.bf16 %v1150_v31  ;;  %v746_v40 = vmul.f32 %v1144_v36, %v741_v19 }
 0x171   : > { %629 = vst [vmem:[%s1703_s9 + $0x8] sm:$0xff] %v561_v42 }
 0x172   : > { %630 = vst [vmem:[%s1703_s9 + $0x10] sm:$0xff] %v577_v45  ;;  %v747_v41 = vmul.f32 %v1145_v37, %v741_v19 }
 0x173   : > { %631 = vst [vmem:[%s1703_s9 + $0x18] sm:$0xff] %v593_v46 }
 0x175   : > { %v546_v48 = vpop.f32.mrf.mxu2  ;;  %v562_v49 = vpop.f32.mrf.mxu3 }
 0x177   : > { %v578_v50 = vpop.f32.mrf.mxu0  ;;  %v594_v51 = vpop.f32.mrf.mxu1 }
 0x17e   : > { %v608_v56 = vpop.f32.mrf.mxu2  ;;  %v624_v57 = vpop.f32.mrf.mxu3 }
 0x17f   : > { %v609_v58 = vadd.f32 %v608_v56, %v524_v54  ;;  %v625_v59 = vadd.f32 %v624_v57, %v525_v55  ;;  %v651_v60 = vpop.f32.mrf.mxu0  ;;  %v664_v61 = vpop.f32.mrf.mxu1 }
 0x180   : > { %v720_v62 = vpack.c.bf16 %v651_v60, %v651_v60  ;;  %v721_v63 = vpack.c.bf16 %v664_v61, %v664_v61 }
 0x181   : > { %632 = vst [vmem:[%s1703_s9 + $0x20] sm:$0xff] %v609_v58 }
 0x182   : > { %633 = vst [vmem:[%s1703_s9 + $0x28] sm:$0xff] %v625_v59  ;;  %1094 = vmatmul.msk.bf16.vlgmr.msra.gmra.mxu2 %vm388_vm0, %v720_v62  ;;  %1095 = vmatmul.msk.bf16.vlgmr.msra.gmra.mxu3 %vm388_vm0, %v721_v63 }
 0x186   : > { %v610_v0 = vpop.f32.mrf.mxu2  ;;  %v626_v1 = vpop.f32.mrf.mxu3 }
 0x187   : > { %v653_v2 = vpop.f32.mrf.mxu0  ;;  %v666_v3 = vpop.f32.mrf.mxu1 }
 0x18e   : > { %v677_v4 = vpop.f32.mrf.mxu2  ;;  %v690_v5 = vpop.f32.mrf.mxu3 }
 0x18f   : > { %v722_v6 = vpack.c.bf16 %v677_v4, %v677_v4  ;;  %v723_v7 = vpack.c.bf16 %v690_v5, %v690_v5  ;;  %v703_v8 = vpop.f32.mrf.mxu0  ;;  %v716_v9 = vpop.f32.mrf.mxu1 }
 0x190   : > { %v724_v10 = vpack.c.bf16 %v703_v8, %v703_v8  ;;  %v725_v11 = vpack.c.bf16 %v716_v9, %v716_v9 }
 0x191   : > { %1096 = vmatmul.msk.bf16.vlgmr.msrb.gmra.mxu0 %vm388_vm0, %v722_v6  ;;  %1097 = vmatmul.msk.bf16.vlgmr.msrb.gmra.mxu1 %vm388_vm0, %v723_v7 }
 0x192   : > { %1098 = vmatmul.msk.bf16.vlgmr.msrb.gmra.mxu2 %vm388_vm0, %v724_v10  ;;  %1099 = vmatmul.msk.bf16.vlgmr.msrb.gmra.mxu3 %vm388_vm0, %v725_v11 }
 0x196   : > { %v679_v12 = vpop.f32.mrf.mxu2  ;;  %v692_v13 = vpop.f32.mrf.mxu3 }
 0x197   : > { %v705_v14 = vpop.f32.mrf.mxu0  ;;  %v718_v15 = vpop.f32.mrf.mxu1 }
 0x205   : > { %v766_v23 = vpop.f32.mrf.mxu2  ;;  %v782_v24 = vpop.f32.mrf.mxu3 }
 0x206   : > { %v767_v25 = vadd.f32 %v766_v23, %v742_v20  ;;  %v783_v26 = vadd.f32 %v782_v24, %v743_v21 }
 0x208   : > { %1100 = vst [vmem:[%s1703_s9 + $0x30] sm:$0xff] %v767_v25 }
 0x209   : > { %1101 = vst [vmem:[%s1703_s9 + $0x38] sm:$0xff] %v783_v26 }
 0x20d   : > { %v768_v32 = vpop.f32.mrf.mxu2  ;;  %v784_v33 = vpop.f32.mrf.mxu3 }
 0x20e   : > { %v798_v34 = vpop.f32.mrf.mxu0  ;;  %v814_v35 = vpop.f32.mrf.mxu1 }
 0x20f   : > { %v799_v38 = vadd.f32 %v798_v34, %v744_v29  ;;  %v815_v39 = vadd.f32 %v814_v35, %v745_v30 }
 0x211   : > { %1102 = vst [vmem:[%s1703_s9 + $0x40] sm:$0xff] %v799_v38 }
 0x212   : > { %1103 = vst [vmem:[%s1703_s9 + $0x48] sm:$0xff] %v815_v39 }
 0x215   : > { %v830_v42 = vpop.f32.mrf.mxu2  ;;  %v846_v43 = vpop.f32.mrf.mxu3 }
 0x216   : > { %v831_v44 = vadd.f32 %v830_v42, %v746_v40  ;;  %v847_v45 = vadd.f32 %v846_v43, %v747_v41  ;;  %v800_v46 = vpop.f32.mrf.mxu0  ;;  %v816_v47 = vpop.f32.mrf.mxu1 }
 0x218   : > { %1104 = vst [vmem:[%s1703_s9 + $0x50] sm:$0xff] %v831_v44 }
 0x219   : > { %1105 = vst [vmem:[%s1703_s9 + $0x58] sm:$0xff] %v847_v45 }
 0x21a   : > { %1399 = shalt.err (!%p1396_p9)
}
 0x21b   : > { %s1460_s23 = smov 128   ;;  %s1461_s6 = smov 8  }
 0x21c   : > { %1170 = dma.vmem_to_hbm [thread:$0]  (%p1564_p5), %s872_s22, 1536, %s874_s13, %s858_s15, %s1460_s23, %s1460_s23, %s1461_s6  }
 0x21d   : > { %v832_v48 = vpop.f32.mrf.mxu2  ;;  %v848_v49 = vpop.f32.mrf.mxu3 }
 0x21e PF: > { %s888_s24 = sand.u32 1, %s1442_s18   ;;  %p1790_p12 = scmp.ge.s32.totalorder %s1454_s21, 2 }
 0x21f   : > { %s889_s10 = scalar_lea.sflag [#allocation4], %s888_s24 }
 0x220   : > { %p1190_p13 = pnand %p1790_p12, %p1527_p6 }
 0x222   : > { %p1191_p0 = pneg %p1190_p13 }
 0x224   : > { %1437 = dma.done.wait (%p1191_p0), %s889_s10, 1536  }
 0x225   : > { %1439 = vsyncadd (%p1191_p0), %s889_s10, 4294965760  ;;  %s1791_s21 = sld [smem:[#allocation20_spill]]  ;;  %s1794_s18 = smov %s1446_s19 }
 0x226   : > { %s1792_s8 = sld [smem:[#allocation19_spill]] }
 0x227   : > { %s1793_s20 = sld [smem:[#allocation21_spill]] }
 0x22b   : > { %p25_p5 = scmp.ge.s32.totalorder %s1791_s21, 4  }
 0x22c   : > { %s1795_s19 = smov %s1792_s8 }
 0x22d   :  { %27 = sbr.rel (!%p25_p5) target bundleno = 13 (0xd), region = 124 }
 0x232   :  { %895 = vsyncpa [#allocation3], 1 }
 0x233   :  { %897 = vsyncpa [#allocation3 + $0x1], 1 }
 0x234   :  { %898 = vsyncpa [#allocation7], 1 }
 0x235   :  { %900 = vsyncpa [#allocation7 + $0x1], 1 }
 0x236   :  { %901 = vsyncpa [#allocation10], 1 }
 0x237   :  { %903 = vsyncpa [#allocation10 + $0x1], 1 }
 0x238   :  { %904 = vsyncpa [#allocation4], 1 }
 0x239   :  { %906 = vsyncpa [#allocation4 + $0x1], 1 }
 0x23a   :  { %907 = vsyncpa [#allocation5], 1 }
 0x23b   :  { %909 = vsyncpa [#allocation5 + $0x1], 1 }

</bundles_post_ra>
